<compile_context>
chip_gen: v6e
topology: v6e:2x2x1
jax: 0.10.0
libtpu: 0.0.40
codegen_flags: <defaults>
</compile_context>

<pallas_src>
import functools

import jax
import jax.numpy as jnp
from jax import lax
from jax.experimental import pallas as pl
from jax.experimental.pallas import tpu as pltpu

TILE_P = 512     # pixel tile (lane axis) for CE / lovasz-prep kernels
TILE_G = 256     # pixel tile for lovasz-grad kernel (tri is TILE_G x TILE_G bf16)
assert TILE_P % TILE_G == 0


# --------------------------------------------------------------------------
# Kernel 1: weighted cross-entropy, fused across the 5 deep-supervision levels
# (ignore_index handled via zero weight; all 5 levels share the same target,
# per-pixel class weight and validity mask, and the same CE denominator).
# --------------------------------------------------------------------------
def _ce_fused_kernel(l0_ref, l1_ref, l2_ref, l3_ref, l4_ref, tgt_ref, w_ref,
                     nll_ref, wsum_ref, *, ignore_index, coeffs):
    @pl.when(pl.program_id(0) == 0)
    def _():
        nll_ref[...] = jnp.zeros_like(nll_ref)
        wsum_ref[...] = jnp.zeros_like(wsum_ref)

    t = tgt_ref[...]                                     # (1, TP) int32
    w = w_ref[...]                                       # (C, 1)  f32
    c = w.shape[0]
    tp = t.shape[1]

    cls = lax.broadcasted_iota(jnp.int32, (c, tp), 0)
    onehot = cls == t                                    # (C, TP)
    valid = t != ignore_index                            # (1, TP)
    wt = jnp.sum(jnp.where(onehot, w, 0.0), axis=0, keepdims=True)   # w[y_i]
    wt = jnp.where(valid, wt, 0.0)                       # zero for ignored pixels

    acc = jnp.zeros((1, tp), jnp.float32)                # sum_l coef_l * (-log p_l[y])
    for coef, lref in zip(coeffs, (l0_ref, l1_ref, l2_ref, l3_ref, l4_ref)):
        logits = lref[...].astype(jnp.float32)           # (C, TP)
        m = jnp.max(logits, axis=0, keepdims=True)
        lse = jnp.log(jnp.sum(jnp.exp(logits - m), axis=0, keepdims=True)) + m
        sel = jnp.sum(jnp.where(onehot, logits, 0.0), axis=0, keepdims=True)
        acc = acc + coef * (lse - sel)

    # TODO(synk): on v7x, per-tile partial outputs would let this grid run
    # "parallel" across both TensorCores instead of a serial accumulation.
    nll_ref[...] += jnp.sum(wt * acc).reshape(1, 1)
    wsum_ref[...] += jnp.sum(wt).reshape(1, 1)


def fused_weighted_ce(logits_cp_list, target_row, cls_weights, ignore_index, coeffs):
    C, P = logits_cp_list[0].shape
    kern = functools.partial(_ce_fused_kernel, ignore_index=ignore_index,
                             coeffs=tuple(coeffs))
    logit_spec = pl.BlockSpec((C, TILE_P), lambda i: (0, i))
    nll, wsum = pl.pallas_call(
        kern,
        out_shape=(jax.ShapeDtypeStruct((1, 1), jnp.float32),
                   jax.ShapeDtypeStruct((1, 1), jnp.float32)),
        grid_spec=pltpu.PrefetchScalarGridSpec(
            num_scalar_prefetch=0,
            grid=(P // TILE_P,),
            in_specs=[logit_spec] * 5 + [
                pl.BlockSpec((1, TILE_P), lambda i: (0, i)),
                pl.BlockSpec((C, 1), lambda i: (0, 0))],
            out_specs=(pl.BlockSpec((1, 1), lambda i: (0, 0)),
                       pl.BlockSpec((1, 1), lambda i: (0, 0)))),
        compiler_params=pltpu.CompilerParams(dimension_semantics=("arbitrary",)),
    )(*logits_cp_list, target_row, cls_weights.reshape(C, 1))
    # sum_l coef_l * CE_l == (sum_l coef_l * nll_sum_l) / w_sum  (shared denominator)
    return jnp.where(wsum[0, 0] > 0.0, nll[0, 0] / wsum[0, 0], 0.0)


# --------------------------------------------------------------------------
# Kernel 2: lovasz prep — per-class foreground and |fg - p| errors.
# Emits the NEGATED error (so one ascending lax.sort == descending-by-error)
# and fg in bf16 (exact: values are 0/1) to halve its HBM traffic.
# No accumulator -> fully "parallel" grid (megacore-friendly).
# --------------------------------------------------------------------------
def _lovasz_prep_kernel(probas_ref, tgt_ref, negerr_ref, fg_ref, *, ignore_label):
    p = probas_ref[...].astype(jnp.float32)              # (C, TP)
    t = tgt_ref[...]                                     # (1, TP)
    c, tp = p.shape

    cls = lax.broadcasted_iota(jnp.int32, (c, tp), 0)
    valid = t != ignore_label                            # (1, TP)
    fg = jnp.where(jnp.logical_and(cls == t, valid), 1.0, 0.0)
    err = jnp.where(valid, jnp.abs(fg - p), 0.0)         # ignored pixels -> 0 error

    negerr_ref[...] = -err
    fg_ref[...] = fg.astype(fg_ref.dtype)


# --------------------------------------------------------------------------
# Kernel 3: lovasz gradient + dot, running cumsum carried across pixel tiles.
# In-tile cumsum of fg is a (C,TILE_G) x (TILE_G,TILE_G) bf16 MXU matmul with
# f32 accumulation (fg/tri are exactly 0/1, so this is bit-exact).
# --------------------------------------------------------------------------
def _lovasz_grad_kernel(negerr_ref, fg_ref, gts_ref, tri_ref, out_ref, carry_ref):
    i = pl.program_id(0)

    @pl.when(i == 0)
    def _():
        out_ref[...] = jnp.zeros_like(out_ref)
        carry_ref[...] = jnp.zeros_like(carry_ref)

    fg_bf = fg_ref[...]                                  # (C, TG) bf16
    err = -negerr_ref[...]                               # (C, TG) f32 (undo negation)
    gts = gts_ref[...]                                   # (C, 1)
    c, tg = err.shape

    local = jnp.dot(fg_bf, tri_ref[...], preferred_element_type=jnp.float32)
    fg = fg_bf.astype(jnp.float32)
    cum = carry_ref[...] + local                         # inclusive cumsum of fg

    base = (i * tg).astype(jnp.float32)
    pos = base + lax.broadcasted_iota(jnp.int32, (c, tg), 1).astype(jnp.float32) + 1.0

    union = gts + pos - cum
    jac = 1.0 - (gts - cum) / union

    cum_p = cum - fg
    pos_p = pos - 1.0
    union_p = gts + pos_p - cum_p
    union_p = jnp.where(union_p == 0.0, 1.0, union_p)    # only hit when gts==0 (class
    jac_p = 1.0 - (gts - cum_p) / union_p                # is masked by 'present' anyway)

    grad = jac - jac_p                                   # lovasz_grad discrete difference
    out_ref[...] += jnp.sum(err * grad, axis=-1, keepdims=True)
    carry_ref[...] = cum[:, tg - 1:tg]


def lovasz_softmax_loss(probas_cp, target_row, ignore_label=0):
    C, P = probas_cp.shape

    kern = functools.partial(_lovasz_prep_kernel, ignore_label=ignore_label)
    negerr, fg = pl.pallas_call(
        kern,
        out_shape=(jax.ShapeDtypeStruct((C, P), jnp.float32),
                   jax.ShapeDtypeStruct((C, P), jnp.bfloat16)),
        grid_spec=pltpu.PrefetchScalarGridSpec(
            num_scalar_prefetch=0,
            grid=(P // TILE_P,),
            in_specs=[pl.BlockSpec((C, TILE_P), lambda i: (0, i)),
                      pl.BlockSpec((1, TILE_P), lambda i: (0, i))],
            out_specs=(pl.BlockSpec((C, TILE_P), lambda i: (0, i)),
                       pl.BlockSpec((C, TILE_P), lambda i: (0, i)))),
        compiler_params=pltpu.CompilerParams(dimension_semantics=("parallel",)),
    )(probas_cp, target_row)

    # Per-class foreground counts straight from the labels (keeps prep grid parallel).
    tgt = target_row[0]
    valid = tgt != ignore_label
    gts = jnp.sum(((tgt[None, :] == jnp.arange(C, dtype=jnp.int32)[:, None])
                   & valid[None, :]).astype(jnp.float32), axis=1).reshape(C, 1)

    # TODO(synk): global per-class descending sort has no clean Pallas TPU
    # primitive; done as ONE fused lax.sort (key + fg payload) in XLA.
    negerr_sorted, fg_sorted = lax.sort((negerr, fg), dimension=1, num_keys=1)

    tri = (lax.broadcasted_iota(jnp.int32, (TILE_G, TILE_G), 0)
           <= lax.broadcasted_iota(jnp.int32, (TILE_G, TILE_G), 1)).astype(jnp.bfloat16)

    class_losses = pl.pallas_call(
        _lovasz_grad_kernel,
        out_shape=jax.ShapeDtypeStruct((C, 1), jnp.float32),
        grid_spec=pltpu.PrefetchScalarGridSpec(
            num_scalar_prefetch=0,
            grid=(P // TILE_G,),
            in_specs=[pl.BlockSpec((C, TILE_G), lambda i: (0, i)),
                      pl.BlockSpec((C, TILE_G), lambda i: (0, i)),
                      pl.BlockSpec((C, 1), lambda i: (0, 0)),
                      pl.BlockSpec((TILE_G, TILE_G), lambda i: (0, 0))],
            out_specs=pl.BlockSpec((C, 1), lambda i: (0, 0)),
            scratch_shapes=[pltpu.VMEM((C, 1), jnp.float32)]),
        compiler_params=pltpu.CompilerParams(dimension_semantics=("arbitrary",)),
    )(negerr_sorted, fg_sorted, gts, tri)

    present = (gts.reshape(C) > 0).astype(jnp.float32)   # classes='present'
    n_present = jnp.sum(present)
    lsum = jnp.sum(class_losses.reshape(C) * present)
    return jnp.where(n_present > 0, lsum / jnp.maximum(n_present, 1.0), 0.0)


# --------------------------------------------------------------------------
# GT_LovaszLoss.forward
# --------------------------------------------------------------------------
def _nchw_to_cp(x):
    B, C, H, W = x.shape
    return jnp.transpose(x, (1, 0, 2, 3)).reshape(C, B * H * W)


def gt_lovasz_loss(gt_pre, out, target, cls_weights, num_classes):
    """gt_pre = (gt_pre5, gt_pre4, gt_pre3, gt_pre2, gt_pre1) logits NCHW,
    out = class probabilities NCHW, target = [B, H, W] int labels."""
    B, C, H, W = out.shape
    P = B * H * W
    pad = (-P) % TILE_P
    Pp = P + pad

    target_p = target.reshape(P).astype(jnp.int32)
    pad_cp = lambda x_cp: jnp.pad(x_cp, ((0, 0), (0, pad)))
    # padded pixels: label 0 == lovasz ignore, label num_classes == CE ignore_index
    tgt_lov = jnp.pad(target_p, (0, pad), constant_values=0).reshape(1, Pp)
    tgt_ce = jnp.pad(target_p, (0, pad), constant_values=num_classes).reshape(1, Pp)

    lov = lovasz_softmax_loss(pad_cp(_nchw_to_cp(out)), tgt_lov, ignore_label=0)

    coeffs = (0.1, 0.2, 0.3, 0.4, 0.5)                   # gt_pre5 .. gt_pre1
    logits_cp = [pad_cp(_nchw_to_cp(g)) for g in gt_pre]
    ce_total = fused_weighted_ce(logits_cp, tgt_ce,
                                 cls_weights.astype(jnp.float32),
                                 num_classes, coeffs)
    return lov + ce_total


if __name__ == "__main__":
    key = jax.random.PRNGKey(0)
    B, C, H, W = 2, 6, 16, 16            # num_classes = 6
    num_classes = C

    k1, k2, k3 = jax.random.split(key, 3)
    # deterministic class weights (module stores cls_weights passed to __init__)
    cls_weights = jnp.linspace(0.5, 1.5, C).astype(jnp.float32)

    # labels in [0, num_classes]; value num_classes = CE ignore, 0 = lovasz ignore
    target = jax.random.randint(k1, (B, H, W), 0, num_classes + 1, dtype=jnp.int32)

    out_logits = jax.random.normal(k2, (B, C, H, W), dtype=jnp.float32)
    out_probs = jax.nn.softmax(out_logits, axis=1)

    gt_keys = jax.random.split(k3, 5)
    gt_pre = tuple(jax.random.normal(k, (B, C, H, W), dtype=jnp.float32)
                   for k in gt_keys)

    loss = gt_lovasz_loss(gt_pre, out_probs, target, cls_weights, num_classes)
    jax.block_until_ready(loss)
    print("KERNEL_OK")
</pallas_src>

<mosaic_0001>
module attributes {stable_mosaic.version = 11 : i64} {
  func.func @_lovasz_prep_kernel(%arg0: i32, %arg1: memref<6x512xf32, #tpu.memory_space<vmem>>, %arg2: memref<1x512xi32, #tpu.memory_space<vmem>>, %arg3: memref<6x512xf32, #tpu.memory_space<vmem>>, %arg4: memref<6x512xbf16, #tpu.memory_space<vmem>>) attributes {dimension_semantics = [#tpu.dimension_semantics<parallel>], iteration_bounds = array<i64: 1>, scalar_prefetch = 0 : i64, scratch_operands = 0 : i64, tpu.core_type = #tpu.core_type<tc>, window_params = [{transform_indices = @transform_0, window_bounds = array<i64: 6, 512>}, {transform_indices = @transform_1, window_bounds = array<i64: 1, 512>}, {transform_indices = @transform_2, window_bounds = array<i64: 6, 512>}, {transform_indices = @transform_3, window_bounds = array<i64: 6, 512>}]} {
    %c0 = arith.constant 0 : index
    %c0_0 = arith.constant 0 : index
    %0 = vector.load %arg1[%c0, %c0_0] : memref<6x512xf32, #tpu.memory_space<vmem>>, vector<6x512xf32>
    %c0_1 = arith.constant 0 : index
    %c0_2 = arith.constant 0 : index
    %1 = vector.load %arg2[%c0_1, %c0_2] : memref<1x512xi32, #tpu.memory_space<vmem>>, vector<1x512xi32>
    %2 = tpu.iota {dimensions = array<i32: 0>} : vector<6x512xi32>
    %c0_i32 = arith.constant 0 : i32
    %3 = vector.broadcast %c0_i32 : i32 to vector<1x512xi32>
    %4 = arith.cmpi ne, %1, %3 : vector<1x512xi32>
    %5 = vector.broadcast %1 : vector<1x512xi32> to vector<6x512xi32>
    %6 = arith.cmpi eq, %2, %5 : vector<6x512xi32>
    %7 = vector.broadcast %4 : vector<1x512xi1> to vector<6x512xi1>
    %8 = arith.andi %6, %7 : vector<6x512xi1>
    %cst = arith.constant 1.000000e+00 : f32
    %cst_3 = arith.constant 0.000000e+00 : f32
    %9 = vector.broadcast %cst : f32 to vector<6x512xf32>
    %10 = vector.broadcast %cst_3 : f32 to vector<6x512xf32>
    %11 = arith.select %8, %9, %10 : vector<6x512xi1>, vector<6x512xf32>
    %12 = arith.subf %11, %0 : vector<6x512xf32>
    %13 = math.absf %12 : vector<6x512xf32>
    %cst_4 = arith.constant 0.000000e+00 : f32
    %14 = vector.shape_cast %4 : vector<1x512xi1> to vector<1x512xi1>
    %15 = vector.broadcast %14 : vector<1x512xi1> to vector<6x512xi1>
    %16 = vector.broadcast %cst_4 : f32 to vector<6x512xf32>
    %17 = arith.select %15, %13, %16 : vector<6x512xi1>, vector<6x512xf32>
    %cst_5 = arith.constant 0.000000e+00 : f32
    %18 = vector.broadcast %cst_5 : f32 to vector<6x512xf32>
    %19 = arith.subf %18, %17 : vector<6x512xf32>
    %c0_6 = arith.constant 0 : index
    %c0_7 = arith.constant 0 : index
    %20 = vector.load %arg3[%c0_6, %c0_7] : memref<6x512xf32, #tpu.memory_space<vmem>>, vector<6x512xf32>
    tpu.vector_store %arg3[%c0_6, %c0_7], %19 {strides = array<i32>} : memref<6x512xf32, #tpu.memory_space<vmem>>, vector<6x512xf32>,
    %21 = arith.truncf %11 : vector<6x512xf32> to vector<6x512xbf16>
    %c0_8 = arith.constant 0 : index
    %c0_9 = arith.constant 0 : index
    %22 = vector.load %arg4[%c0_8, %c0_9] : memref<6x512xbf16, #tpu.memory_space<vmem>>, vector<6x512xbf16>
    tpu.vector_store %arg4[%c0_8, %c0_9], %21 {strides = array<i32>} : memref<6x512xbf16, #tpu.memory_space<vmem>>, vector<6x512xbf16>,
    return
  }
  func.func @transform_0(%arg0: i32) -> (i32, i32) {
    %c0_i32 = arith.constant 0 : i32
    %c0_i32_0 = arith.constant 0 : i32
    return %c0_i32, %arg0 : i32, i32
  }
  func.func @transform_1(%arg0: i32) -> (i32, i32) {
    %c0_i32 = arith.constant 0 : i32
    %c0_i32_0 = arith.constant 0 : i32
    return %c0_i32, %arg0 : i32, i32
  }
  func.func @transform_2(%arg0: i32) -> (i32, i32) {
    %c0_i32 = arith.constant 0 : i32
    %c0_i32_0 = arith.constant 0 : i32
    return %c0_i32, %arg0 : i32, i32
  }
  func.func @transform_3(%arg0: i32) -> (i32, i32) {
    %c0_i32 = arith.constant 0 : i32
    %c0_i32_0 = arith.constant 0 : i32
    return %c0_i32, %arg0 : i32, i32
  }
}

</mosaic_0001>

<bundles_post_ra>
// kernel: tpu_custom_call.1
= control target key start
LH: loop header
LB: loop body
LE: loop exit
PB: predicated region body
PF: predicated region fallthrough
CT: control target
= control target key end

     0   :  { %9 = vsyncpa [#allocation3], 0  ;;  %s308_s0 = inlined_call_operand.hbm [shape: f32[6,512], index: 0, kind: input, shape index: {}]   ;;  %s309_s1 = inlined_call_operand.hbm [shape: s32[1,512], index: 1, kind: input, shape index: {}]   ;;  %s310_s2 = inlined_call_operand.hbm [shape: f32[6,512], index: 2, kind: output, shape index: {0}]   ;;  %s311_s3 = inlined_call_operand.hbm [shape: bf16[6,512], index: 3, kind: output, shape index: {1}]  }
   0x1   :  { %10 = vsyncpa [#allocation6], 0 }
   0x2   :  { %11 = vsyncpa [#allocation4], 0 }
   0x3   :  { %12 = vsyncpa [#allocation9], 0  ;;  %s262_s12 = smov [#allocation2]   ;;  %s263_s14 = smov [#allocation5]  }
   0x4   :  { %s19_s13 = sshll.u32 %s262_s12, 4  ;;  %s29_s15 = sshll.u32 %s263_s14, 4  ;;  %s20_s13 = int_to_ptr.vmem [resolvable:$true] %s19_s13  ;;  %s30_s15 = int_to_ptr.vmem [resolvable:$true] %s29_s15 }
   0x5   :  { %s182_s16 = scalar_lea.vmem %s20_s13, 512  ;;  %p187_p1 = scmp.lt.s32.totalorder %s20_s13, %s20_s13 }
   0x6   :  { %p183_p0 = scmp.ne.s32.totalorder %s20_s13, %s182_s16  ;;  %p188_p2 = scmp.lt.s32.totalorder %s182_s16, %s182_s16 }
   0x8   :  { %p189_p3 = por %p188_p2, %p187_p1 }
   0xa   :  { %p190_p4 = pnand %p189_p3, %p183_p0 }
   0xc   :  { %193 = shalt.err (!%p190_p4)
}
   0xd   :  { %22 = dma.hbm_to_vmem [thread:$0]  %s308_s0, 512, %s20_s13, [#allocation3]  }
   0xe   :  { %s202_s19 = scalar_lea.vmem %s30_s15, 64  ;;  %p207_p6 = scmp.lt.s32.totalorder %s30_s15, %s30_s15 }
   0xf   :  { %p203_p5 = scmp.ne.s32.totalorder %s30_s15, %s202_s19  ;;  %p208_p7 = scmp.lt.s32.totalorder %s202_s19, %s202_s19 }
  0x11   :  { %p209_p8 = por %p208_p7, %p207_p6 }
  0x13   :  { %p210_p9 = pnand %p209_p8, %p203_p5 }
  0x15   :  { %213 = shalt.err (!%p210_p9)
}
  0x16   :  { %32 = dma.hbm_to_vmem [thread:$0]  %s309_s1, 64, %s30_s15, [#allocation6]  }
  0x17   :  { %254 = dma.done.wait [#allocation3], 512  }
  0x18   :  { %255 = vsyncadd [#allocation3], 4294966784 }
  0x19   :  { %256 = dma.done.wait [#allocation6], 64  }
  0x1a   :  { %257 = vsyncadd [#allocation6], 4294967232  ;;  %v44_v0 = vlaneseq  ;;  %v43_v6 = vld [vmem:[#allocation5] sm:$0xf]  ;;  %v264_v10 = vmov 0   ;;  %v265_v19 = vmov 0.0  }
  0x1b   :  { %vm46_vm0 = vcmp.ne.s32.totalorder %v43_v6, 0  ;;  %v39_v17 = vld [vmem:[#allocation2] sm:$0x3f]  ;;  %v40_v18 = vld [vmem:[#allocation2 + $0x8] sm:$0x3f]  ;;  %s266_s0 = smov [#allocation8]  }
  0x1c   :  { %v45_v1 = vshrl.u32 %v44_v0, 7  ;;  %v67_v11 = vsel %vm46_vm0, 1, %v264_v10  ;;  %v41_v21 = vld [vmem:[#allocation2 + $0x10] sm:$0x3f]  ;;  %v42_v24 = vld [vmem:[#allocation2 + $0x18] sm:$0x3f] }
  0x1d   :  { %s150_s1 = sshll.u32 %s266_s0, 4  ;;  %s267_s22 = smov [#allocation7]   ;;  %s151_s1 = int_to_ptr.vmem [resolvable:$true] %s150_s1 }
  0x1e   :  { %v49_v2 = vsub.s32 0, %v45_v1  ;;  %v53_v3 = vsub.s32 1, %v45_v1  ;;  %v57_v4 = vsub.s32 2, %v45_v1  ;;  %v61_v5 = vsub.s32 3, %v45_v1  ;;  %s140_s23 = sshll.u32 %s267_s22, 4  ;;  %s214_s24 = scalar_lea.vmem %s151_s1, 256  ;;  %s141_s23 = int_to_ptr.vmem [resolvable:$true] %s140_s23 }
  0x1f   :  { %p215_p10 = scmp.ne.s32.totalorder %s151_s1, %s214_s24  ;;  %p219_p11 = scmp.lt.s32.totalorder %s151_s1, %s151_s1 }
  0x20   :  { %v50_v7 = vrot.slane %v43_v6, %v49_v2  ;;  %v54_v8 = vrot.slane %v43_v6, %v53_v3  ;;  %v58_v9 = vrot.slane %v43_v6, %v57_v4  ;;  %v62_v12 = vrot.slane %v43_v6, %v61_v5  ;;  %p220_p12 = scmp.lt.s32.totalorder %s214_s24, %s214_s24 }
  0x21   :  { %v71_v13 = vrot.slane %v67_v11, %v49_v2  ;;  %v75_v14 = vrot.slane %v67_v11, %v53_v3  ;;  %v79_v15 = vrot.slane %v67_v11, %v57_v4  ;;  %v83_v16 = vrot.slane %v67_v11, %v61_v5 }
  0x22   :  { %vm63_vm1 = vcmp.eq.s32.totalorder %v45_v1, %v50_v7  ;;  %vm64_vm2 = vcmp.eq.s32.totalorder %v45_v1, %v54_v8  ;;  %vm65_vm5 = vcmp.eq.s32.totalorder %v45_v1, %v58_v9  ;;  %vm66_vm8 = vcmp.eq.s32.totalorder %v45_v1, %v62_v12  ;;  %p221_p13 = por %p220_p12, %p219_p11 }
  0x23   :  { %vm84_vm3 = vcmp.eq.s32.totalorder %v71_v13, 1  ;;  %vm85_vm4 = vcmp.eq.s32.totalorder %v75_v14, 1  ;;  %vm86_vm7 = vcmp.eq.s32.totalorder %v79_v15, 1  ;;  %vm87_vm9 = vcmp.eq.s32.totalorder %v83_v16, 1 }
  0x24   :  { %vm88_vm6 = vmand %vm63_vm1, %vm84_vm3  ;;  %p222_p0 = pnand %p221_p13, %p215_p10 }
  0x25   :  { %v92_v20 = vsel %vm88_vm6, 1.0, %v265_v19  ;;  %vm89_vm10 = vmand %vm64_vm2, %vm85_vm4 }
  0x26   :  { %v96_v22 = vsub.f32 %v92_v20, %v39_v17  ;;  %v93_v23 = vsel %vm89_vm10, 1.0, %v265_v19  ;;  %vm90_vm11 = vmand %vm65_vm5, %vm86_vm7 }
  0x27   :  { %v97_v25 = vsub.f32 %v93_v23, %v40_v18  ;;  %v94_v26 = vsel %vm90_vm11, 1.0, %v265_v19  ;;  %vm91_vm12 = vmand %vm66_vm8, %vm87_vm9  ;;  %v166_v27 = vpack.c.bf16 %v93_v23, %v92_v20 }
  0x28   :  { %v100_v28 = vand.u32 2147483647, %v96_v22  ;;  %v98_v29 = vsub.f32 %v94_v26, %v41_v21  ;;  %v95_v30 = vsel %vm91_vm12, 1.0, %v265_v19 }
  0x29   :  { %v101_v31 = vand.u32 2147483647, %v97_v25  ;;  %v99_v32 = vsub.f32 %v95_v30, %v42_v24  ;;  %132 = vst [vmem:[#allocation8] sm:$0x77] %v166_v27  ;;  %v167_v33 = vpack.c.bf16 %v95_v30, %v94_v26 }
  0x2a   :  { %v104_v34 = vsel %vm84_vm3, %v100_v28, 0.0  ;;  %v102_v35 = vand.u32 2147483647, %v98_v29 }
  0x2b   :  { %v108_v36 = vsub.f32 0.0, %v104_v34  ;;  %v105_v37 = vsel %vm85_vm4, %v101_v31, 0.0  ;;  %v103_v38 = vand.u32 2147483647, %v99_v32  ;;  %133 = vst [vmem:[#allocation8 + $0x8] sm:$0x77] %v167_v33 }
  0x2c   :  { %v109_v39 = vsub.f32 0.0, %v105_v37  ;;  %v106_v40 = vsel %vm86_vm7, %v102_v35, 0.0 }
  0x2d   :  { %225 = shalt.err (!%p222_p0)
}
  0x2e   :  { %153 = dma.vmem_to_hbm [thread:$0]  %s151_s1, 256, %s311_s3, [#allocation9]   ;;  %112 = vst [vmem:[#allocation7] sm:$0x3f] %v108_v36  ;;  %v110_v41 = vsub.f32 0.0, %v106_v40  ;;  %v107_v42 = vsel %vm87_vm9, %v103_v38, 0.0 }
  0x2f   :  { %113 = vst [vmem:[#allocation7 + $0x8] sm:$0x3f] %v109_v39  ;;  %v111_v43 = vsub.f32 0.0, %v107_v42  ;;  %s234_s27 = scalar_lea.vmem %s141_s23, 512  ;;  %p239_p2 = scmp.lt.s32.totalorder %s141_s23, %s141_s23 }
  0x30   :  { %114 = vst [vmem:[#allocation7 + $0x10] sm:$0x3f] %v110_v41  ;;  %p235_p1 = scmp.ne.s32.totalorder %s141_s23, %s234_s27  ;;  %p240_p3 = scmp.lt.s32.totalorder %s234_s27, %s234_s27 }
  0x31   :  { %115 = vst [vmem:[#allocation7 + $0x18] sm:$0x3f] %v111_v43 }
  0x32   :  { %p241_p4 = por %p240_p3, %p239_p2 }
  0x34   :  { %p242_p5 = pnand %p241_p4, %p235_p1 }
  0x36   :  { %245 = shalt.err (!%p242_p5)
}
  0x37   :  { %143 = dma.vmem_to_hbm [thread:$0]  %s141_s23, 512, %s310_s2, [#allocation4]  }
  0x38   :  { %258 = dma.done.wait [#allocation4], 512  }
  0x39   :  { %259 = vsyncadd [#allocation4], 4294966784 }
  0x3a   :  { %260 = dma.done.wait [#allocation9], 256  }
  0x3b   :  { %261 = vsyncadd [#allocation9], 4294967040 }
  0x3c   :  { %160 = vsyncpa [#allocation3], 1 }
  0x3d   :  { %161 = vsyncpa [#allocation6], 1 }
  0x3e   :  { %162 = vsyncpa [#allocation4], 1 }
  0x3f   :  { %163 = vsyncpa [#allocation9], 1 }

</bundles_post_ra>
